<compile_context>
chip_gen: v5e
topology: v5e:2x2
jax: 0.10.0
libtpu: 0.0.40
codegen_flags: <defaults>
</compile_context>

<pallas_src>
import functools

import jax
import jax.numpy as jnp
from jax import lax
from jax.experimental import pallas as pl
from jax.experimental.pallas import tpu as pltpu

_KVOL = 27  # 3*3*3

# Taps (kd,kh,kw) in {1,2}^3 coincide with the 2x2x2 MaxPool window of each stride-2
# output position, so they are placed first -> pool = max over the first 8*C_in rows.
_POOL_TAPS = [(kd, kh, kw) for kd in (1, 2) for kh in (1, 2) for kw in (1, 2)]
_ALL_TAPS = [(kd, kh, kw) for kd in range(3) for kh in range(3) for kw in range(3)]
_TAP_ORDER = _POOL_TAPS + [t for t in _ALL_TAPS if t not in _POOL_TAPS]


def _downsample_kernel(w_ref, p_ref, o_ref, *, c_conv, c_in):
    """One M-tile of fused conv3d(im2col matmul) + maxpool3d + concat + relu."""
    p = p_ref[...]                                    # (27*c_in, tm) bf16, lanes = tm
    # Conv3d hot path: (c_conv, K) @ (K, tm) on the MXU with f32 accumulation.
    conv = jnp.dot(w_ref[...], p, preferred_element_type=jnp.float32)
    # MaxPool3d(2, stride=2): the 8 window taps are the first 8*c_in rows -> 7 VPU maxes.
    pool = p[0:c_in, :]
    for t in range(1, 8):
        pool = jnp.maximum(pool, p[t * c_in:(t + 1) * c_in, :])
    # torch.cat([conv, pool], 1) + ReLU, written as two static sublane-slice stores
    # (no concatenated temp; the output block stays a single lane-dense (C_out, tm) tile).
    o_ref[0:c_conv, :] = jnp.maximum(conv, 0.0).astype(o_ref.dtype)
    o_ref[c_conv:, :] = jnp.maximum(pool, 0).astype(o_ref.dtype)


def _pick_tile_m(k_rows, c_out, m_aligned, *, vmem_budget=12 << 20, tm_cap=4096):
    """Largest lane tile whose double-buffered working set fits the VMEM budget."""
    # 2x bf16 patch buffers + 2x f32 output buffers, per lane column.
    bytes_per_lane = 2 * k_rows * 2 + 2 * c_out * 4
    tm = (vmem_budget // bytes_per_lane) // 128 * 128
    return int(max(128, min(tm, tm_cap, m_aligned)))


def downsample_block3d(x, w, *, tm=None, stream_dtype=jnp.bfloat16):
    """DownsampleBlock3d forward.

    x: (N, C_in, D, H, W)  float32 (NCDHW, like PyTorch)
    w: (C_out - C_in, C_in, 3, 3, 3)  Conv3d weight (k=3, s=2, p=1, no bias)
    returns: (N, C_out, D//2, H//2, W//2)
    """
    N, C_in, D, H, W = x.shape
    C_conv = w.shape[0]
    C_out = C_conv + C_in
    assert D % 2 == 0 and H % 2 == 0 and W % 2 == 0
    OD, OH, OW = D // 2, H // 2, W // 2
    M = N * OD * OH * OW
    K = _KVOL * C_in

    # Lane-aligned M tiling: tm is a multiple of 128, auto-sized to the VMEM budget so the
    # per-grid-step overhead (~0.35 us) is amortized over the largest possible tile.
    m_aligned = ((M + 127) // 128) * 128
    if tm is None:
        tm = _pick_tile_m(K, C_out, m_aligned)
    else:
        tm = max(128, (tm // 128) * 128)
        tm = min(tm, m_aligned)
    m_pad = ((m_aligned + tm - 1) // tm) * tm

    # ---- wrapper glue: K-major im2col in the streaming dtype. Stays NCDHW throughout so
    # the channel axis never round-trips through the lane dimension (cheaper relayout than
    # the NDHWC path). ----
    # TODO(synk): the im2col slab is still materialized once in HBM (~1.7x of x in bf16);
    # a manual-DMA kernel over a padded NCDHW input could remove that remaining pass.
    xs = x.astype(stream_dtype)
    xp = jnp.pad(xs, ((0, 0), (0, 0), (1, 1), (1, 1), (1, 1)))      # zero pad=1 (conv only)
    taps = [xp[:, :, kd:kd + 2 * OD:2, kh:kh + 2 * OH:2, kw:kw + 2 * OW:2]
            for (kd, kh, kw) in _TAP_ORDER]                         # each (N, C, OD, OH, OW)
    patches = jnp.stack(taps, axis=0)                               # (27, N, C, OD, OH, OW)
    patches = jnp.transpose(patches, (0, 2, 1, 3, 4, 5)).reshape(K, M)
    patches = jnp.pad(patches, ((0, 0), (0, m_pad - M)))            # (K, Mpad)

    # PyTorch Conv3d weight (O, I, kd, kh, kw) -> (O, tap*I) in the same tap order.
    w_mat = jnp.stack([w[:, :, kd, kh, kw] for (kd, kh, kw) in _TAP_ORDER], axis=1)
    w_mat = w_mat.reshape(C_conv, K).astype(stream_dtype)

    kernel = functools.partial(_downsample_kernel, c_conv=C_conv, c_in=C_in)
    out = pl.pallas_call(
        kernel,
        out_shape=jax.ShapeDtypeStruct((C_out, m_pad), jnp.float32),
        grid_spec=pltpu.PrefetchScalarGridSpec(
            num_scalar_prefetch=0,
            grid=(m_pad // tm,),
            in_specs=[
                pl.BlockSpec((C_conv, K), lambda i: (0, 0)),   # resident weights
                pl.BlockSpec((K, tm), lambda i: (0, i)),       # streamed patch tile
            ],
            out_specs=pl.BlockSpec((C_out, tm), lambda i: (0, i)),
        ),
        compiler_params=pltpu.CompilerParams(
            dimension_semantics=("parallel",),                 # megacore / v7x 2-TC split
            vmem_limit_bytes=32 * 1024 * 1024,
        ),
    )(w_mat, patches)

    y = out[:, :M].reshape(C_out, N, OD, OH, OW)
    return jnp.transpose(y, (1, 0, 2, 3, 4)).astype(x.dtype)        # back to NCDHW


def _reference(x, w):
    """Pure-JAX reference matching the PyTorch module semantics."""
    conv = lax.conv_general_dilated(
        x, w, window_strides=(2, 2, 2), padding=((1, 1), (1, 1), (1, 1)),
        dimension_numbers=("NCDHW", "OIDHW", "NCDHW"),
    )
    pool = lax.reduce_window(
        x, -jnp.inf, lax.max,
        window_dimensions=(1, 1, 2, 2, 2),
        window_strides=(1, 1, 2, 2, 2),
        padding="VALID",
    )
    return jnp.maximum(jnp.concatenate([conv, pool], axis=1), 0.0)


if __name__ == "__main__":
    # Small shapes consistent with the module: c_in=4, c_out=8, spatial 8^3.
    N, C_in, C_out = 2, 4, 8
    D = H = W = 8

    key = jax.random.PRNGKey(0)
    kx, kw = jax.random.split(key)
    x = jax.random.normal(kx, (N, C_in, D, H, W), dtype=jnp.float32)
    w = 0.1 * jax.random.normal(kw, (C_out - C_in, C_in, 3, 3, 3), dtype=jnp.float32)

    fwd = jax.jit(downsample_block3d)
    y = jax.block_until_ready(fwd(x, w))
    assert y.shape == (N, C_out, D // 2, H // 2, W // 2), y.shape

    # Tight logic check: reference on the same bf16-rounded inputs (kernel accumulates f32).
    x_bf = x.astype(jnp.bfloat16).astype(jnp.float32)
    w_bf = w.astype(jnp.bfloat16).astype(jnp.float32)
    assert jnp.allclose(y, _reference(x_bf, w_bf), atol=2e-3, rtol=2e-3), "logic mismatch"

    # Loose semantic check vs the full-precision module (bf16 streaming error budget).
    assert jnp.allclose(y, _reference(x, w), atol=1e-1, rtol=1e-1), "semantic mismatch"

    print("KERNEL_OK")
</pallas_src>

<mosaic_0001>
module attributes {stable_mosaic.version = 11 : i64} {
  func.func @_downsample_kernel(%arg0: i32, %arg1: memref<4x108xbf16, #tpu.memory_space<vmem>>, %arg2: memref<108x128xbf16, #tpu.memory_space<vmem>>, %arg3: memref<8x128xf32, #tpu.memory_space<vmem>>) attributes {dimension_semantics = [#tpu.dimension_semantics<parallel>], iteration_bounds = array<i64: 1>, scalar_prefetch = 0 : i64, scratch_operands = 0 : i64, tpu.core_type = #tpu.core_type<tc>, window_params = [{pipeline_mode = #tpu.pipeline_mode<synchronous>, transform_indices = @transform_0, window_bounds = array<i64: 4, 108>}, {transform_indices = @transform_1, window_bounds = array<i64: 108, 128>}, {transform_indices = @transform_2, window_bounds = array<i64: 8, 128>}]} {
    %c0 = arith.constant 0 : index
    %c0_0 = arith.constant 0 : index
    %0 = vector.load %arg2[%c0, %c0_0] : memref<108x128xbf16, #tpu.memory_space<vmem>>, vector<108x128xbf16>
    %c0_1 = arith.constant 0 : index
    %c0_2 = arith.constant 0 : index
    %1 = vector.load %arg1[%c0_1, %c0_2] : memref<4x108xbf16, #tpu.memory_space<vmem>>, vector<4x108xbf16>
    %cst = arith.constant dense<0.000000e+00> : vector<4x128xf32>
    %2 = tpu.matmul %1, %0, %cst {dimension_numbers = #tpu.dot_dimension_numbers<[1], [0], [0], [1], [0, 0, 1, 1], [], []>} : vector<4x108xbf16>, vector<108x128xbf16>, vector<4x128xf32> -> vector<4x128xf32>
    %3 = vector.extract_strided_slice %0 {offsets = [0, 0], sizes = [4, 128], strides = [1, 1]} : vector<108x128xbf16> to vector<4x128xbf16>
    %4 = vector.extract_strided_slice %0 {offsets = [4, 0], sizes = [4, 128], strides = [1, 1]} : vector<108x128xbf16> to vector<4x128xbf16>
    %5 = arith.maximumf %3, %4 : vector<4x128xbf16>
    %6 = vector.extract_strided_slice %0 {offsets = [8, 0], sizes = [4, 128], strides = [1, 1]} : vector<108x128xbf16> to vector<4x128xbf16>
    %7 = arith.maximumf %5, %6 : vector<4x128xbf16>
    %8 = vector.extract_strided_slice %0 {offsets = [12, 0], sizes = [4, 128], strides = [1, 1]} : vector<108x128xbf16> to vector<4x128xbf16>
    %9 = arith.maximumf %7, %8 : vector<4x128xbf16>
    %10 = vector.extract_strided_slice %0 {offsets = [16, 0], sizes = [4, 128], strides = [1, 1]} : vector<108x128xbf16> to vector<4x128xbf16>
    %11 = arith.maximumf %9, %10 : vector<4x128xbf16>
    %12 = vector.extract_strided_slice %0 {offsets = [20, 0], sizes = [4, 128], strides = [1, 1]} : vector<108x128xbf16> to vector<4x128xbf16>
    %13 = arith.maximumf %11, %12 : vector<4x128xbf16>
    %14 = vector.extract_strided_slice %0 {offsets = [24, 0], sizes = [4, 128], strides = [1, 1]} : vector<108x128xbf16> to vector<4x128xbf16>
    %15 = arith.maximumf %13, %14 : vector<4x128xbf16>
    %16 = vector.extract_strided_slice %0 {offsets = [28, 0], sizes = [4, 128], strides = [1, 1]} : vector<108x128xbf16> to vector<4x128xbf16>
    %17 = arith.maximumf %15, %16 : vector<4x128xbf16>
    %cst_3 = arith.constant 0.000000e+00 : f32
    %18 = vector.broadcast %cst_3 : f32 to vector<4x128xf32>
    %19 = arith.maximumf %2, %18 : vector<4x128xf32>
    %c0_4 = arith.constant 0 : index
    %c0_5 = arith.constant 0 : index
    %20 = vector.load %arg3[%c0_4, %c0_5] : memref<8x128xf32, #tpu.memory_space<vmem>>, vector<4x128xf32>
    tpu.vector_store %arg3[%c0_4, %c0_5], %19 {strides = array<i32>} : memref<8x128xf32, #tpu.memory_space<vmem>>, vector<4x128xf32>,
    %cst_6 = arith.constant 0.000000e+00 : bf16
    %21 = vector.broadcast %cst_6 : bf16 to vector<4x128xbf16>
    %22 = arith.maximumf %17, %21 : vector<4x128xbf16>
    %23 = arith.extf %22 : vector<4x128xbf16> to vector<4x128xf32>
    %c4 = arith.constant 4 : index
    %c0_7 = arith.constant 0 : index
    %24 = vector.load %arg3[%c4, %c0_7] : memref<8x128xf32, #tpu.memory_space<vmem>>, vector<4x128xf32>
    tpu.vector_store %arg3[%c4, %c0_7], %23 {strides = array<i32>} : memref<8x128xf32, #tpu.memory_space<vmem>>, vector<4x128xf32>,
    return
  }
  func.func @transform_0(%arg0: i32) -> (i32, i32) {
    %c0_i32 = arith.constant 0 : i32
    %c0_i32_0 = arith.constant 0 : i32
    %c0_i32_1 = arith.constant 0 : i32
    return %c0_i32, %c0_i32_0 : i32, i32
  }
  func.func @transform_1(%arg0: i32) -> (i32, i32) {
    %c0_i32 = arith.constant 0 : i32
    %c0_i32_0 = arith.constant 0 : i32
    return %c0_i32, %arg0 : i32, i32
  }
  func.func @transform_2(%arg0: i32) -> (i32, i32) {
    %c0_i32 = arith.constant 0 : i32
    %c0_i32_0 = arith.constant 0 : i32
    return %c0_i32, %arg0 : i32, i32
  }
}

</mosaic_0001>

<bundles_post_ra>
// kernel: downsample_block3d.1
= control target key start
LH: loop header
LB: loop body
LE: loop exit
PB: predicated region body
PF: predicated region fallthrough
CT: control target
= control target key end

     0   :  { %vm72_vm0 = vcmask 1045504   ;;  %vm68_vm1 = vcmask 883712   ;;  %s226_s1 = inlined_call_operand.vmem [shape: bf16[108,128], index: 1, kind: input, shape index: {}]   ;;  %s227_s0 = inlined_call_operand.vmem [shape: bf16[4,108], index: 0, kind: input, shape index: {}]   ;;  %s228_s2 = inlined_call_operand.vmem [shape: f32[8,128], index: 2, kind: output, shape index: {}]  }
   0x1   :  { %v162_v0 = vld [vmem:[%s226_s1 + $0x30] sm:$0xf]  ;;  %v171_v1 = vld [vmem:[%s226_s1 + $0x30] sm:$0x30]  ;;  %v170_v4 = vld [vmem:[%s226_s1 + $0x28] sm:$0xff] }
   0x2   :  { %v163_v2 = vor.u32 %v171_v1, %v162_v0  ;;  %v169_v5 = vld [vmem:[%s226_s1 + $0x20] sm:$0xff]  ;;  %v168_v6 = vld [vmem:[%s226_s1 + $0x18] sm:$0xff]  ;;  %v167_v7 = vld [vmem:[%s226_s1 + $0x10] sm:$0xff] }
   0x3   :  { %v166_v8 = vld [vmem:[%s226_s1 + $0x8] sm:$0xff]  ;;  %v165_v9 = vld [vmem:[%s226_s1] sm:$0xff] }
   0x4   :  { %v74_v3 = vsel %vm72_vm0, %v163_v2, 0  ;;  %v26_v10 = vld [vmem:[%s227_s0] sm:$0x3]  ;;  %v14_v16 = vld [vmem:[%s226_s1 + $0x8] sm:$0xff]  }
   0x5   :  { %77 = vmatpush.bf16.msra.mxu0 %v74_v3  ;;  %v12_v11 = vld [vmem:[%s226_s1] sm:$0xff]   ;;  %v106_v20 = vunpack.c.l.bf16 %v14_v16  ;;  %v116_v24 = vunpack.c.h.bf16 %v14_v16 }
   0x6   :  { %v89_v12 = vunpack.c.l.bf16 %v12_v11  ;;  %v96_v15 = vunpack.c.h.bf16 %v12_v11 }
   0x7   :  { %v111_v22 = vrot.slane %v106_v20, 4  ;;  %v121_v26 = vrot.slane %v116_v24, 4 }
   0x8   :  { %v91_v13 = vrot.slane %v89_v12, 4  ;;  %v101_v18 = vrot.slane %v96_v15, 4 }
   0x9   :  { %78 = vmatpush.bf16.msra.mxu0 %v170_v4 }
   0xa   :  { %v93_v14 = vmax.f32 %v89_v12, %v91_v13 }
   0xc   :  { %v97_v17 = vmax.f32 %v93_v14, %v96_v15 }
   0xd   :  { %79 = vmatpush.bf16.msra.mxu0 %v169_v5 }
   0xe   :  { %v103_v19 = vmax.f32 %v97_v17, %v101_v18 }
  0x10   :  { %v107_v21 = vmax.f32 %v103_v19, %v106_v20 }
  0x11   :  { %80 = vmatpush.bf16.msra.mxu0 %v168_v6 }
  0x12   :  { %v113_v23 = vmax.f32 %v107_v21, %v111_v22 }
  0x14   :  { %v117_v25 = vmax.f32 %v113_v23, %v116_v24 }
  0x15   :  { %81 = vmatpush.bf16.msra.mxu0 %v167_v7 }
  0x16   :  { %v123_v27 = vmax.f32 %v117_v25, %v121_v26 }
  0x18   :  { %v128_v28 = vmax.f32 %v123_v27, 0.0 }
  0x19   :  { %82 = vmatpush.bf16.msra.mxu0 %v166_v8 }
  0x1a   :  { %v129_v29 = vpack.c.bf16 %v128_v28, %v128_v28 }
  0x1c   :  { %v130_v30 = vunpack.c.l.bf16 %v129_v29 }
  0x1d   :  { %83 = vmatpush.bf16.msra.mxu0 %v165_v9 }
  0x1e   :  { %131 = vst [vmem:[%s228_s2 + $0x4] sm:$0xf] %v130_v30 }
  0x20   :  { %164 = vmatmul.msk.bf16.vlgmr.msra.gmra.mxu0 %vm68_vm1, %v26_v10 }
  0x9d   :  { %v85_v31 = vpop.f32.mrf.mxu0 }
  0x9e   :  { %v125_v32 = vmax.f32 %v85_v31, 0.0 }
  0xa0   :  { %126 = vst [vmem:[%s228_s2] sm:$0xf] %v125_v32 }
  0xa5   :  { %v87_v33 = vpop.f32.mrf.mxu0 }

</bundles_post_ra>
